<compile_context>
chip_gen: v5e
topology: v5e:2x2
jax: 0.10.0
libtpu: 0.0.40
codegen_flags: <defaults>
</compile_context>

<pallas_src>
import functools
from typing import NamedTuple

import jax
import jax.numpy as jnp
from jax import lax
from jax.experimental import pallas as pl
from jax.experimental.pallas import tpu as pltpu


def _round_up(x, m):
    return ((x + m - 1) // m) * m


# --------------------------------------------------------------------------------------
# Kernels
# --------------------------------------------------------------------------------------
def _linear_kernel_1pass(x_ref, w_ref, b_ref, o_ref):
    """K fully resident: o[i,j] = x[i,:] @ w[:,j] + b[j]; written exactly once."""
    o_ref[...] = (
        jnp.dot(x_ref[...], w_ref[...], preferred_element_type=jnp.float32)
        + b_ref[...].astype(jnp.float32)
    ).astype(o_ref.dtype)


def _linear_kernel_ksplit(x_ref, w_ref, b_ref, o_ref, acc_ref):
    """Split-K fallback (very large K): f32 accumulator, bias + store on last k step."""
    k = pl.program_id(2)

    @pl.when(k == 0)
    def _():
        acc_ref[...] = jnp.zeros_like(acc_ref)

    acc_ref[...] += jnp.dot(x_ref[...], w_ref[...], preferred_element_type=jnp.float32)

    @pl.when(k == pl.num_programs(2) - 1)
    def _():
        o_ref[...] = (acc_ref[...] + b_ref[...].astype(jnp.float32)).astype(o_ref.dtype)


# --------------------------------------------------------------------------------------
# Tile planning
# --------------------------------------------------------------------------------------
class _Plan(NamedTuple):
    tm: int
    tn: int
    tk: int
    split_k: bool


def _vmem_budget_bytes():
    """~75% of physical VMEM: ~48 MiB on v7x (64 MiB), ~96 MiB on v5e/v6e (128 MiB)."""
    cap = 64 * 1024 * 1024
    try:
        cap = int(pltpu.get_tpu_info().vmem_capacity_bytes)
    except Exception:
        pass
    return max(32 * 1024 * 1024, (cap * 3) // 4)


def _pick_plan(M, N, K, in_itemsize, out_itemsize, vmem_budget):
    Kp = _round_up(K, 128)
    Np = _round_up(N, 128)
    Mp = _round_up(M, 8)

    # N tiles: lane-dense 128-multiples that DIVIDE the 128-rounded N, so the weight is
    # never padded beyond the (8,128) minimum (review: per-call weight padding cost).
    n_cands = ([Np] if Np <= 1024 else []) + [
        t for t in (512, 384, 256, 128) if t < Np and Np % t == 0
    ]
    if not n_cands:
        n_cands = [128]
    # M tiles: 8-multiples; padding extra x rows is cheap so they need not divide Mp.
    m_cands = ([Mp] if Mp <= 1024 else []) + [
        t for t in (512, 256, 128, 64, 32, 16, 8) if t < Mp
    ]

    def fits_1pass(tm, tn):
        work = (
            2 * (tm * Kp + Kp * tn + tn) * in_itemsize  # double-buffered x / W / bias
            + 2 * tm * tn * out_itemsize                # double-buffered output tile
        )
        return work <= vmem_budget

    # ---- Plan A (preferred): K resident, 2-D grid, no accumulator revolve. ----
    best = None  # (score, tm, tn)
    for tm in m_cands:
        for tn in n_cands:
            if fits_1pass(tm, tn):
                score = (tm * tn, tn)
                if best is None or score > best[0]:
                    best = (score, tm, tn)
    if best is not None:
        _, tm, tn = best
        # Keep >= 2 parallel grid blocks so both v7x TensorCores get work; split along M
        # (cheaper than splitting N: no extra weight traffic / padding).
        grid_blocks = (-(-M // tm)) * (Np // tn)
        if grid_blocks < 2 and Mp > 8:
            tm = _round_up((Mp + 1) // 2, 8)
        return _Plan(tm=tm, tn=tn, tk=Kp, split_k=False)

    # ---- Plan B: K too large to keep resident -> split K with an f32 accumulator. ----
    tm = 256 if Mp >= 256 else Mp
    tn = next((t for t in n_cands if t <= 512), 128)
    fixed = tm * tn * 4 + 2 * tm * tn * out_itemsize + 2 * tn * in_itemsize
    tk = (vmem_budget - fixed) // (2 * (tm + tn) * in_itemsize)
    tk = max(128, (tk // 128) * 128)
    tk = min(tk, Kp)
    return _Plan(tm=tm, tn=tn, tk=tk, split_k=True)


# --------------------------------------------------------------------------------------
# pallas_call wrappers (called from inside the jitted forward; shapes are static here)
# --------------------------------------------------------------------------------------
def _pallas_linear_1pass(xp, wTp, b2d, out_dtype, tm, tn, vmem_limit):
    M, K = xp.shape
    _, N = wTp.shape
    grid = (M // tm, N // tn)
    in_isz = xp.dtype.itemsize
    cost = pl.CostEstimate(
        flops=2 * M * N * K,
        transcendentals=0,
        # Actual traffic: x re-read per N tile, W re-read per M tile.
        bytes_accessed=int(
            M * K * in_isz * (N // tn)
            + K * N * in_isz * (M // tm)
            + M * N * jnp.dtype(out_dtype).itemsize
            + N * 4
        ),
    )
    return pl.pallas_call(
        _linear_kernel_1pass,
        out_shape=jax.ShapeDtypeStruct((M, N), out_dtype),
        grid_spec=pltpu.PrefetchScalarGridSpec(
            num_scalar_prefetch=0,
            grid=grid,
            in_specs=[
                pl.BlockSpec((tm, K), lambda i, j: (i, 0)),  # x tile (full K)
                pl.BlockSpec((K, tn), lambda i, j: (0, j)),  # W tile, (K, N) layout
                pl.BlockSpec((1, tn), lambda i, j: (0, j)),  # bias tile
            ],
            out_specs=pl.BlockSpec((tm, tn), lambda i, j: (i, j)),
        ),
        compiler_params=pltpu.CompilerParams(
            dimension_semantics=("parallel", "parallel"),
            vmem_limit_bytes=int(vmem_limit),
        ),
        cost_estimate=cost,
    )(xp, wTp, b2d)


def _pallas_linear_ksplit(xp, wTp, b2d, out_dtype, tm, tn, tk, vmem_limit):
    M, K = xp.shape
    _, N = wTp.shape
    grid = (M // tm, N // tn, K // tk)
    in_isz = xp.dtype.itemsize
    cost = pl.CostEstimate(
        flops=2 * M * N * K,
        transcendentals=0,
        bytes_accessed=int(
            M * K * in_isz * (N // tn)
            + K * N * in_isz * (M // tm)
            + M * N * jnp.dtype(out_dtype).itemsize
            + N * 4
        ),
    )
    return pl.pallas_call(
        _linear_kernel_ksplit,
        out_shape=jax.ShapeDtypeStruct((M, N), out_dtype),
        grid_spec=pltpu.PrefetchScalarGridSpec(
            num_scalar_prefetch=0,
            grid=grid,
            in_specs=[
                pl.BlockSpec((tm, tk), lambda i, j, k: (i, k)),  # x tile
                pl.BlockSpec((tk, tn), lambda i, j, k: (k, j)),  # W tile, (K, N) layout
                pl.BlockSpec((1, tn), lambda i, j, k: (0, j)),   # bias tile
            ],
            out_specs=pl.BlockSpec((tm, tn), lambda i, j, k: (i, j)),
            scratch_shapes=[pltpu.VMEM((tm, tn), jnp.float32)],
        ),
        compiler_params=pltpu.CompilerParams(
            dimension_semantics=("parallel", "parallel", "arbitrary"),
            vmem_limit_bytes=int(vmem_limit),
        ),
        cost_estimate=cost,
    )(xp, wTp, b2d)


# --------------------------------------------------------------------------------------
# Forward path (everything — pad / transpose / kernel / slice — under one jit)
# --------------------------------------------------------------------------------------
def _xla_linear(x2d, weight, bias):
    # Tiny-problem fallback: XLA fused dot (contract K directly, no weight.T in HBM).
    y = lax.dot_general(
        x2d, weight,
        dimension_numbers=(((1,), (1,)), ((), ())),
        preferred_element_type=jnp.float32,
    )
    return (y + bias[None, :].astype(jnp.float32)).astype(x2d.dtype)


# Below ~2 MFLOPs per-step overhead + launch cost dominates; let XLA handle it.
_MIN_FLOPS_FOR_PALLAS = 1 << 21


def _linear_impl(x2d, weight, bias, *, force_pallas, use_bf16):
    M, K = x2d.shape
    N, Kw = weight.shape
    assert K == Kw and bias.shape == (N,)
    out_dtype = x2d.dtype

    if (not force_pallas) and (2 * M * N * K < _MIN_FLOPS_FOR_PALLAS):
        return _xla_linear(x2d, weight, bias)

    in_dtype = jnp.bfloat16 if use_bf16 else x2d.dtype
    in_isz = jnp.dtype(in_dtype).itemsize
    out_isz = jnp.dtype(out_dtype).itemsize

    budget = _vmem_budget_bytes()
    plan = _pick_plan(M, N, K, in_isz, out_isz, budget)

    Kp = _round_up(K, plan.tk)
    Np = _round_up(_round_up(N, 128), plan.tn)
    Mp = _round_up(M, plan.tm)

    # x: cast (optional bf16) + pad rows/K. Zero K-padding is exact for the contraction.
    xp = x2d.astype(in_dtype)
    if (Mp, Kp) != (M, K):
        xp = jnp.pad(xp, ((0, Mp - M), (0, Kp - K)))
    # W: transpose once to (K, N) (standard MXU contraction, no per-step XLU transpose),
    # then pad. Done inside the same jit so XLA fuses transpose+pad into one pass.
    # TODO(synk): callers that own the parameters can pre-transpose/pad W at init time.
    wT = weight.T.astype(in_dtype)
    if (Kp, Np) != (K, N):
        wT = jnp.pad(wT, ((0, Kp - K), (0, Np - N)))
    b2 = bias.astype(jnp.float32)
    if Np != N:
        b2 = jnp.pad(b2, (0, Np - N))
    b2 = b2.reshape(1, Np)

    if plan.split_k:
        yp = _pallas_linear_ksplit(xp, wT, b2, out_dtype, plan.tm, plan.tn, plan.tk, budget)
    else:
        yp = _pallas_linear_1pass(xp, wT, b2, out_dtype, plan.tm, plan.tn, budget)
    return yp[:M, :N]


@functools.partial(jax.jit, static_argnames=("force_pallas", "use_bf16"))
def torch_linear_forward(x, weight, bias, force_pallas=False, use_bf16=False):
    """Mimics torch_linear.forward: nn.Linear applied to the last dim of x.

    x: [..., in_dim], weight: [out_dim, in_dim], bias: [out_dim].
    use_bf16=True casts x/W to bf16 (f32 accumulation) — faster, lower precision.
    """
    orig_shape = x.shape
    in_dim = orig_shape[-1]
    out_dim = weight.shape[0]
    x2d = x.reshape(-1, in_dim)
    y2d = _linear_impl(x2d, weight, bias, force_pallas=force_pallas, use_bf16=use_bf16)
    return y2d.reshape(*orig_shape[:-1], out_dim)


# --------------------------------------------------------------------------------------
# Demo / correctness checks
# --------------------------------------------------------------------------------------
if __name__ == "__main__":
    key = jax.random.PRNGKey(0)

    def init_linear(k, out_dim, in_dim):
        kw, kb = jax.random.split(k)
        bound = 1.0 / (in_dim ** 0.5)
        w = jax.random.uniform(kw, (out_dim, in_dim), jnp.float32, -bound, bound)
        b = jax.random.uniform(kb, (out_dim,), jnp.float32, -bound, bound)
        return w, b

    HI = lax.Precision.HIGHEST

    # --- Case 1: module-scale shapes (batch=8, in=32, out=16), forced through Pallas. ---
    k1, k2, key = jax.random.split(key, 3)
    w1, b1 = init_linear(k2, 16, 32)
    x1 = jax.random.normal(k1, (8, 32), jnp.float32)
    y1 = jax.block_until_ready(torch_linear_forward(x1, w1, b1, force_pallas=True))
    ref1 = jnp.matmul(x1, w1.T, precision=HI) + b1
    assert y1.shape == (8, 16)
    assert jnp.allclose(y1, ref1, atol=2e-2, rtol=2e-2), "case1 (pallas, tiny) mismatch"

    # --- Case 1b: same shapes via the small-problem XLA fallback (default dispatch). ---
    y1b = jax.block_until_ready(torch_linear_forward(x1, w1, b1))
    assert jnp.allclose(y1b, ref1, atol=2e-2, rtol=2e-2), "case1b (xla fallback) mismatch"

    # --- Case 2: 3-D activations, large enough to hit the tiled Pallas path. ---
    k1, k2, key = jax.random.split(key, 3)
    w2, b2 = init_linear(k2, 384, 256)
    x2 = jax.random.normal(k1, (2, 64, 256), jnp.float32)
    y2 = jax.block_until_ready(torch_linear_forward(x2, w2, b2))
    ref2 = jnp.matmul(x2.reshape(-1, 256), w2.T, precision=HI) + b2
    assert y2.shape == (2, 64, 384)
    assert jnp.allclose(y2.reshape(-1, 384), ref2, atol=2e-2, rtol=2e-2), "case2 mismatch"

    # --- Case 3: optional bf16 inputs with f32 accumulation. ---
    y3 = jax.block_until_ready(torch_linear_forward(x2, w2, b2, use_bf16=True))
    assert jnp.allclose(y3.reshape(-1, 384), ref2, atol=5e-2, rtol=5e-2), "case3 mismatch"

    print("KERNEL_OK")
</pallas_src>

<mosaic_0001>
module attributes {stable_mosaic.version = 11 : i64} {
  func.func @_linear_kernel_1pass(%arg0: i32, %arg1: i32, %arg2: memref<8x128xf32, #tpu.memory_space<vmem>>, %arg3: memref<128x128xf32, #tpu.memory_space<vmem>>, %arg4: memref<1x128xf32, #tpu.memory_space<vmem>>, %arg5: memref<8x128xf32, #tpu.memory_space<vmem>>) attributes {dimension_semantics = [#tpu.dimension_semantics<parallel>, #tpu.dimension_semantics<parallel>], iteration_bounds = array<i64: 1, 1>, scalar_prefetch = 0 : i64, scratch_operands = 0 : i64, tpu.core_type = #tpu.core_type<tc>, window_params = [{transform_indices = @transform_0, window_bounds = array<i64: 8, 128>}, {transform_indices = @transform_1, window_bounds = array<i64: 128, 128>}, {transform_indices = @transform_2, window_bounds = array<i64: 1, 128>}, {transform_indices = @transform_3, window_bounds = array<i64: 8, 128>}]} {
    %c0 = arith.constant 0 : index
    %c0_0 = arith.constant 0 : index
    %0 = vector.load %arg2[%c0, %c0_0] : memref<8x128xf32, #tpu.memory_space<vmem>>, vector<8x128xf32>
    %c0_1 = arith.constant 0 : index
    %c0_2 = arith.constant 0 : index
    %1 = vector.load %arg3[%c0_1, %c0_2] : memref<128x128xf32, #tpu.memory_space<vmem>>, vector<128x128xf32>
    %cst = arith.constant dense<0.000000e+00> : vector<8x128xf32>
    %2 = tpu.matmul %0, %1, %cst {dimension_numbers = #tpu.dot_dimension_numbers<[1], [0], [0], [1], [0, 0, 1, 1], [], []>} : vector<8x128xf32>, vector<128x128xf32>, vector<8x128xf32> -> vector<8x128xf32>
    %c0_3 = arith.constant 0 : index
    %c0_4 = arith.constant 0 : index
    %3 = vector.load %arg4[%c0_3, %c0_4] : memref<1x128xf32, #tpu.memory_space<vmem>>, vector<1x128xf32>
    %4 = vector.broadcast %3 : vector<1x128xf32> to vector<8x128xf32>
    %5 = arith.addf %2, %4 : vector<8x128xf32>
    %c0_5 = arith.constant 0 : index
    %c0_6 = arith.constant 0 : index
    %6 = vector.load %arg5[%c0_5, %c0_6] : memref<8x128xf32, #tpu.memory_space<vmem>>, vector<8x128xf32>
    tpu.vector_store %arg5[%c0_5, %c0_6], %5 {strides = array<i32>} : memref<8x128xf32, #tpu.memory_space<vmem>>, vector<8x128xf32>,
    return
  }
  func.func @transform_0(%arg0: i32, %arg1: i32) -> (i32, i32) {
    %c0_i32 = arith.constant 0 : i32
    %c0_i32_0 = arith.constant 0 : i32
    return %arg0, %c0_i32 : i32, i32
  }
  func.func @transform_1(%arg0: i32, %arg1: i32) -> (i32, i32) {
    %c0_i32 = arith.constant 0 : i32
    %c0_i32_0 = arith.constant 0 : i32
    return %c0_i32, %arg1 : i32, i32
  }
  func.func @transform_2(%arg0: i32, %arg1: i32) -> (i32, i32) {
    %c0_i32 = arith.constant 0 : i32
    %c0_i32_0 = arith.constant 0 : i32
    return %c0_i32, %arg1 : i32, i32
  }
  func.func @transform_3(%arg0: i32, %arg1: i32) -> (i32, i32) {
    %c0_i32 = arith.constant 0 : i32
    return %arg0, %arg1 : i32, i32
  }
}

</mosaic_0001>

<bundles_post_ra>
// kernel: torch_linear_forward.1
= control target key start
LH: loop header
LB: loop body
LE: loop exit
PB: predicated region body
PF: predicated region fallthrough
CT: control target
= control target key end

     0   :  { %s179_s0 = inlined_call_operand.vmem [shape: f32[8,128], index: 0, kind: input, shape index: {}]   ;;  %s180_s1 = inlined_call_operand.vmem [shape: f32[128,128], index: 1, kind: input, shape index: {}]   ;;  %s181_s2 = inlined_call_operand.vmem [shape: f32[1,128], index: 2, kind: input, shape index: {}]   ;;  %s182_s3 = inlined_call_operand.hbm [shape: f32[8,128], index: 3, kind: output, shape index: {}]  }
   0x1   :  { %v31_v0 = vld [vmem:[%s180_s1 + $0x78] sm:$0xff]  ;;  %v30_v1 = vld [vmem:[%s180_s1 + $0x70] sm:$0xff]  ;;  %v29_v2 = vld [vmem:[%s180_s1 + $0x68] sm:$0xff] }
   0x2   :  { %36 = vmatpush.msra.mxu0 %v31_v0  ;;  %v28_v3 = vld [vmem:[%s180_s1 + $0x60] sm:$0xff]  ;;  %v27_v4 = vld [vmem:[%s180_s1 + $0x58] sm:$0xff] }
   0x4   :  { %37 = vmatpush.msra.mxu0 %v30_v1 }
   0x6   :  { %38 = vmatpush.msra.mxu0 %v29_v2 }
   0x7   :  { %8 = vsyncpa [#allocation3], 0  ;;  %v26_v5 = vld [vmem:[%s180_s1 + $0x50] sm:$0xff]  ;;  %v25_v6 = vld [vmem:[%s180_s1 + $0x48] sm:$0xff]  ;;  %s101_s21 = smov [#allocation2]   ;;  %s64_s25 = sshll.u32 %s182_s3, 4  ;;  %s65_s25 = int_to_ptr.hbm [resolvable:$true] %s64_s25 }
   0x8   :  { %39 = vmatpush.msra.mxu0 %v28_v3  ;;  %v24_v7 = vld [vmem:[%s180_s1 + $0x40] sm:$0xff]  ;;  %v23_v8 = vld [vmem:[%s180_s1 + $0x38] sm:$0xff]  ;;  %v22_v9 = vld [vmem:[%s180_s1 + $0x30] sm:$0xff]  ;;  %s62_s22 = sshll.u32 %s101_s21, 4  ;;  %s63_s22 = int_to_ptr.vmem [resolvable:$true] %s62_s22 }
   0x9   :  { %v21_v10 = vld [vmem:[%s180_s1 + $0x28] sm:$0xff]  ;;  %v20_v11 = vld [vmem:[%s180_s1 + $0x20] sm:$0xff]  ;;  %v19_v12 = vld [vmem:[%s180_s1 + $0x18] sm:$0xff] }
   0xa   :  { %40 = vmatpush.msra.mxu0 %v27_v4  ;;  %v18_v13 = vld [vmem:[%s180_s1 + $0x10] sm:$0xff]  ;;  %v17_v14 = vld [vmem:[%s180_s1 + $0x8] sm:$0xff]  ;;  %v16_v15 = vld [vmem:[%s180_s1] sm:$0xff] }
   0xb   :  { %v15_v16 = vld [vmem:[%s179_s0] sm:$0xff] }
   0xc   :  { %41 = vmatpush.msra.mxu0 %v26_v5  ;;  %v74_v17 = vld [vmem:[%s181_s2] ss:$0 sm:$0xff] }
   0xe   :  { %42 = vmatpush.msra.mxu0 %v25_v6 }
  0x10   :  { %43 = vmatpush.msra.mxu0 %v24_v7 }
  0x12   :  { %44 = vmatpush.msra.mxu0 %v23_v8 }
  0x14   :  { %45 = vmatpush.msra.mxu0 %v22_v9 }
  0x16   :  { %46 = vmatpush.msra.mxu0 %v21_v10 }
  0x18   :  { %47 = vmatpush.msra.mxu0 %v20_v11 }
  0x1a   :  { %48 = vmatpush.msra.mxu0 %v19_v12 }
  0x1c   :  { %49 = vmatpush.msra.mxu0 %v18_v13 }
  0x1e   :  { %50 = vmatpush.msra.mxu0 %v17_v14 }
  0x20   :  { %51 = vmatpush.msra.mxu0 %v16_v15 }
  0x21   :  { %52 = vmatmul.f32.vlgmr.msra.gmra.mxu0 %v15_v16 }
  0x9e   :  { %v53_v18 = vpop.f32.mrf.mxu0 }
  0x9f   :  { %v54_v19 = vadd.f32 %v74_v17, %v53_v18 }
  0xa1   :  { %56 = vst [vmem:[#allocation2] sm:$0xff] %v54_v19 }
  0xa2   :  { %67 = dma.vmem_to_hbm [thread:$0]  %s63_s22, 128, %s65_s25, [#allocation3]  }
  0xa3   :  { %99 = dma.done.wait [#allocation3], 128  }
  0xa4   :  { %100 = vsyncadd [#allocation3], 4294967168 }
  0xa5   :  { %72 = vsyncpa [#allocation3], 1 }

</bundles_post_ra>
